<compile_context>
chip_gen: v6e
topology: v6e:2x2x1
jax: 0.10.0
libtpu: 0.0.40
codegen_flags: <defaults>
</compile_context>

<pallas_src>
import functools

import jax
import jax.numpy as jnp
from jax.experimental import pallas as pl
from jax.experimental.pallas import tpu as pltpu


def _round_up(n, m):
    return ((n + m - 1) // m) * m


def _fused_linear_relu_kernel(x_ref, w_ref, b_ref, o_ref, acc_ref):
    """One (i, j, k) grid step of relu(x @ W + b_fused).

    x_ref:   (TM, TK) activation tile
    w_ref:   (TK, TN) weight tile
    b_ref:   (1,  TN) fused bias tile (bias - 1 folded in by prepare_params)
    o_ref:   (TM, TN) output tile (same block for every k -> resident output)
    acc_ref: (TM, TN) f32 VMEM accumulator scratch
    """
    k = pl.program_id(2)

    @pl.when(k == 0)
    def _():
        # Fold the fused bias into the accumulator init; the finalize branch
        # then only does ReLU + cast (saves one full-tile VPU add pass).
        acc_ref[...] = jnp.broadcast_to(
            b_ref[...].astype(jnp.float32), acc_ref.shape
        )

    acc_ref[...] += jnp.dot(
        x_ref[...], w_ref[...], preferred_element_type=jnp.float32
    )

    @pl.when(k == pl.num_programs(2) - 1)
    def _():
        o_ref[...] = jnp.maximum(acc_ref[...], 0.0).astype(o_ref.dtype)


def prepare_params(w_torch, b_torch):
    """One-time parameter prep (outside the hot path).

    w_torch: (OUT, IN) PyTorch Linear weight layout
    b_torch: (OUT,)    PyTorch Linear bias
    Returns (w, b_fused) with w:(IN, OUT) and b_fused:(1, OUT) = bias - 1.
    """
    w = jnp.asarray(w_torch).T
    b_fused = (jnp.asarray(b_torch) - 1.0).reshape(1, -1)
    return w, b_fused


@functools.partial(jax.jit, static_argnames=("tm", "tn", "tk", "force_pallas"))
def fused_linear_relu(x, w, b_fused, *, tm=512, tn=512, tk=1024,
                      force_pallas=False):
    """relu(x @ w + b_fused). x:(B,IN) f32, w:(IN,OUT) f32, b_fused:(1,OUT) f32."""
    B, IN = x.shape
    OUT = w.shape[1]

    # Small-problem bypass: grid setup + padded MXU tiles lose to plain XLA
    # below roughly a megaflop of work (the literal spec size is 36 FLOPs).
    if not force_pallas and B * IN * OUT < 1_000_000:
        return jnp.maximum(x @ w + b_fused, 0.0)

    # ---- tile selection (no HBM padding copies in the common case) -------
    # M / N: clamp to full extent when small (full-extent blocks satisfy the
    # (8,128) rule); otherwise keep 8/128-aligned tiles with cdiv edge blocks.
    tm = min(tm, B)
    tn = min(tn, OUT)

    # K (reduction) axis must tile exactly: prefer full-extent, then a
    # 128-multiple divisor tile, and only then fall back to exact zero-padding
    # (padded K contributes 0 to the dot).
    in_padded = IN
    if IN <= tk:
        tk = IN
    elif IN % tk != 0:
        cand = (tk // 128) * 128
        found = None
        while cand >= 128:
            if IN % cand == 0:
                found = cand
                break
            cand -= 128
        if found is not None:
            tk = found
        else:
            in_padded = _round_up(IN, tk)

    if in_padded != IN:
        x = jnp.pad(x, ((0, 0), (0, in_padded - IN)))
        w = jnp.pad(w, ((0, in_padded - IN), (0, 0)))

    grid = (pl.cdiv(B, tm), pl.cdiv(OUT, tn), in_padded // tk)

    # Explicit VMEM budget: double-buffered x/w/bias/out tiles + accumulator,
    # with headroom; >= 32 MiB so v5e's 16 MiB scoped default never clamps,
    # capped safely under v7x's 64 MiB physical VMEM.
    vmem_bytes = 4 * (2 * tm * tk + 2 * tk * tn + 2 * tn + 3 * tm * tn)
    vmem_limit = int(min(max(vmem_bytes + (8 << 20), 32 << 20), 56 << 20))

    out = pl.pallas_call(
        _fused_linear_relu_kernel,
        out_shape=jax.ShapeDtypeStruct((B, OUT), x.dtype),
        grid_spec=pltpu.PrefetchScalarGridSpec(
            num_scalar_prefetch=0,
            grid=grid,
            in_specs=[
                pl.BlockSpec((tm, tk), lambda i, j, k: (i, k)),
                pl.BlockSpec((tk, tn), lambda i, j, k: (k, j)),
                pl.BlockSpec((1, tn), lambda i, j, k: (0, j)),
            ],
            out_specs=pl.BlockSpec((tm, tn), lambda i, j, k: (i, j)),
            scratch_shapes=[pltpu.VMEM((tm, tn), jnp.float32)],
        ),
        compiler_params=pltpu.CompilerParams(
            dimension_semantics=("parallel", "parallel", "arbitrary"),
            vmem_limit_bytes=vmem_limit,
        ),
    )(x, w, b_fused)
    return out


if __name__ == "__main__":
    key = jax.random.PRNGKey(0)
    k_x, k_w, k_b = jax.random.split(key, 3)

    # ---- spec shape: nn.Linear(6, 3) with x1 = torch.randn(1, 6) ----------
    B, IN, OUT = 1, 6, 3
    x1 = jax.random.normal(k_x, (B, IN), dtype=jnp.float32)
    w_torch = jax.random.normal(k_w, (OUT, IN), dtype=jnp.float32) * 0.1
    b_torch = jax.random.normal(k_b, (OUT,), dtype=jnp.float32) * 0.1
    w, b_fused = prepare_params(w_torch, b_torch)

    ref = jnp.maximum(x1 @ w + b_torch.reshape(1, OUT) - 1.0, 0.0)

    # Pallas path (forced, to exercise the kernel at the spec shape).
    out_pallas = fused_linear_relu(x1, w, b_fused, force_pallas=True)
    jax.block_until_ready(out_pallas)
    assert out_pallas.shape == (B, OUT), out_pallas.shape
    assert jnp.allclose(out_pallas, ref, atol=1e-5), (out_pallas, ref)

    # Default path (small-problem bypass) must match too.
    out_fast = fused_linear_relu(x1, w, b_fused)
    jax.block_until_ready(out_fast)
    assert jnp.allclose(out_fast, ref, atol=1e-5), (out_fast, ref)

    # ---- larger shapes: exercise tiling, edge blocks, and the K grid ------
    for (Bt, INt, OUTt) in [(300, 384, 512), (256, 2048, 192)]:
        kk = jax.random.fold_in(key, Bt)
        k1, k2, k3 = jax.random.split(kk, 3)
        xt = jax.random.normal(k1, (Bt, INt), dtype=jnp.float32)
        wt_t = jax.random.normal(k2, (OUTt, INt), dtype=jnp.float32) * 0.05
        bt_t = jax.random.normal(k3, (OUTt,), dtype=jnp.float32) * 0.05
        wt, bt_fused = prepare_params(wt_t, bt_t)

        out_t = fused_linear_relu(xt, wt, bt_fused, force_pallas=True)
        jax.block_until_ready(out_t)
        ref_t = jnp.maximum(xt @ wt + bt_t.reshape(1, OUTt) - 1.0, 0.0)
        assert out_t.shape == (Bt, OUTt), out_t.shape
        assert jnp.allclose(out_t, ref_t, atol=2e-4, rtol=1e-4), (
            float(jnp.max(jnp.abs(out_t - ref_t)))
        )

    print("KERNEL_OK")
</pallas_src>

<mosaic_0001>
module attributes {stable_mosaic.version = 11 : i64} {
  func.func @_fused_linear_relu_kernel(%arg0: i32, %arg1: i32, %arg2: i32, %arg3: memref<1x6xf32, #tpu.memory_space<vmem>>, %arg4: memref<6x3xf32, #tpu.memory_space<vmem>>, %arg5: memref<1x3xf32, #tpu.memory_space<vmem>>, %arg6: memref<1x3xf32, #tpu.memory_space<vmem>>, %arg7: memref<1x3xf32, #tpu.memory_space<vmem>>) attributes {dimension_semantics = [#tpu.dimension_semantics<parallel>, #tpu.dimension_semantics<parallel>, #tpu.dimension_semantics<arbitrary>], iteration_bounds = array<i64: 1, 1, 1>, scalar_prefetch = 0 : i64, scratch_operands = 1 : i64, tpu.core_type = #tpu.core_type<tc>, window_params = [{transform_indices = @transform_0, window_bounds = array<i64: 1, 6>}, {transform_indices = @transform_1, window_bounds = array<i64: 6, 3>}, {transform_indices = @transform_2, window_bounds = array<i64: 1, 3>}, {transform_indices = @transform_3, window_bounds = array<i64: 1, 3>}]} {
    %c0_i32 = arith.constant 0 : i32
    %0 = arith.cmpi eq, %arg2, %c0_i32 : i32
    %1 = arith.extui %0 : i1 to i32
    %c0_i32_0 = arith.constant 0 : i32
    %2 = arith.cmpi ne, %1, %c0_i32_0 : i32
    scf.if %2 {
      %c0_10 = arith.constant 0 : index
      %c0_11 = arith.constant 0 : index
      %12 = vector.load %arg5[%c0_10, %c0_11] : memref<1x3xf32, #tpu.memory_space<vmem>>, vector<1x3xf32>
      %c0_12 = arith.constant 0 : index
      %c0_13 = arith.constant 0 : index
      %13 = vector.load %arg7[%c0_12, %c0_13] : memref<1x3xf32, #tpu.memory_space<vmem>>, vector<1x3xf32>
      tpu.vector_store %arg7[%c0_12, %c0_13], %12 {strides = array<i32>} : memref<1x3xf32, #tpu.memory_space<vmem>>, vector<1x3xf32>,
    } else {
    }
    %c0 = arith.constant 0 : index
    %c0_1 = arith.constant 0 : index
    %3 = vector.load %arg7[%c0, %c0_1] : memref<1x3xf32, #tpu.memory_space<vmem>>, vector<1x3xf32>
    %c0_2 = arith.constant 0 : index
    %c0_3 = arith.constant 0 : index
    %4 = vector.load %arg3[%c0_2, %c0_3] : memref<1x6xf32, #tpu.memory_space<vmem>>, vector<1x6xf32>
    %c0_4 = arith.constant 0 : index
    %c0_5 = arith.constant 0 : index
    %5 = vector.load %arg4[%c0_4, %c0_5] : memref<6x3xf32, #tpu.memory_space<vmem>>, vector<6x3xf32>
    %cst = arith.constant dense<0.000000e+00> : vector<1x3xf32>
    %6 = tpu.matmul %4, %5, %cst {dimension_numbers = #tpu.dot_dimension_numbers<[1], [0], [0], [1], [0, 0, 1, 1], [], []>} : vector<1x6xf32>, vector<6x3xf32>, vector<1x3xf32> -> vector<1x3xf32>
    %7 = arith.addf %3, %6 : vector<1x3xf32>
    %c0_6 = arith.constant 0 : index
    %c0_7 = arith.constant 0 : index
    %8 = vector.load %arg7[%c0_6, %c0_7] : memref<1x3xf32, #tpu.memory_space<vmem>>, vector<1x3xf32>
    tpu.vector_store %arg7[%c0_6, %c0_7], %7 {strides = array<i32>} : memref<1x3xf32, #tpu.memory_space<vmem>>, vector<1x3xf32>,
    %c0_i32_8 = arith.constant 0 : i32
    %9 = arith.cmpi eq, %arg2, %c0_i32_8 : i32
    %10 = arith.extui %9 : i1 to i32
    %c0_i32_9 = arith.constant 0 : i32
    %11 = arith.cmpi ne, %10, %c0_i32_9 : i32
    scf.if %11 {
      %c0_10 = arith.constant 0 : index
      %c0_11 = arith.constant 0 : index
      %12 = vector.load %arg7[%c0_10, %c0_11] : memref<1x3xf32, #tpu.memory_space<vmem>>, vector<1x3xf32>
      %cst_12 = arith.constant 0.000000e+00 : f32
      %13 = vector.broadcast %cst_12 : f32 to vector<1x3xf32>
      %14 = arith.maximumf %12, %13 : vector<1x3xf32>
      %c0_13 = arith.constant 0 : index
      %c0_14 = arith.constant 0 : index
      %15 = vector.load %arg6[%c0_13, %c0_14] : memref<1x3xf32, #tpu.memory_space<vmem>>, vector<1x3xf32>
      tpu.vector_store %arg6[%c0_13, %c0_14], %14 {strides = array<i32>} : memref<1x3xf32, #tpu.memory_space<vmem>>, vector<1x3xf32>,
    } else {
    }
    return
  }
  func.func @transform_0(%arg0: i32, %arg1: i32, %arg2: i32) -> (i32, i32) {
    %c0_i32 = arith.constant 0 : i32
    return %arg0, %arg2 : i32, i32
  }
  func.func @transform_1(%arg0: i32, %arg1: i32, %arg2: i32) -> (i32, i32) {
    %c0_i32 = arith.constant 0 : i32
    return %arg2, %arg1 : i32, i32
  }
  func.func @transform_2(%arg0: i32, %arg1: i32, %arg2: i32) -> (i32, i32) {
    %c0_i32 = arith.constant 0 : i32
    %c0_i32_0 = arith.constant 0 : i32
    return %c0_i32, %arg1 : i32, i32
  }
  func.func @transform_3(%arg0: i32, %arg1: i32, %arg2: i32) -> (i32, i32) {
    %c0_i32 = arith.constant 0 : i32
    return %arg0, %arg1 : i32, i32
  }
}

</mosaic_0001>

<bundles_post_ra>
// kernel: fused_linear_relu.1
= control target key start
LH: loop header
LB: loop body
LE: loop exit
PB: predicated region body
PF: predicated region fallthrough
CT: control target
= control target key end

     0   :  { %vm29_vm0 = vcmask 1045504   ;;  %vm25_vm1 = vcmask 48128   ;;  %v160_v1 = vmov 0.0   ;;  %vm161_vm2 = vmmov 0   ;;  %s195_s0 = inlined_call_operand.vmem [shape: f32[1,6], index: 0, kind: input, shape index: {}]   ;;  %s196_s1 = inlined_call_operand.vmem [shape: f32[6,3], index: 1, kind: input, shape index: {}]   ;;  %s197_s2 = inlined_call_operand.vmem [shape: f32[1,3], index: 2, kind: input, shape index: {}]   ;;  %s198_s3 = inlined_call_operand.hbm [shape: f32[1,3], index: 3, kind: output, shape index: {}]  }
   0x1   :  { %v24_v0 = vld [vmem:[%s196_s1] sm:$0x3f]  ;;  %130 = vmatprep.subr.mxu0 %v160_v1  ;;  %132 = vmatprep.mubr.msk.f32.mxu0 %vm161_vm2, %v160_v1  ;;  %vm20_vm3 = vcmask 16384  }
   0x2   :  { %v23_v2 = vld [vmem:[%s195_s0] sm:$0x1]  ;;  %131 = vmatpush3.msk.msra.mxu0 %vm29_vm0, %v24_v0 }
   0x3   :  { %v19_v3 = vld [vmem:[%s197_s2] sm:$0x1] }
   0x4   :  { %21 = vst.msk [vmem:[#allocation2] sm:$0x1] %vm20_vm3, %v19_v3 }
   0x5   :  { %8 = vsyncpa [#allocation4], 0  ;;  %133 = vmatmul.mubr.msk.f32.vlgmr.msra.gmra.mxu0 %vm25_vm1, %v23_v2  ;;  %s162_s1 = smov [#allocation3]  }
   0x6   :  { %s118_s18 = sshll.u32 %s162_s1, 4  ;;  %s119_s18 = int_to_ptr.vmem [resolvable:$true] %s118_s18 }
   0x7   :  { %s138_s0 = scalar_lea.vmem %s119_s18, 16  ;;  %s142_s19 = scalar_lea.vmem %s119_s18, 32 }
   0x8   :  { %p139_p0 = scmp.ne.s32.totalorder %s119_s18, %s138_s0  ;;  %p143_p1 = scmp.lt.s32.totalorder %s119_s18, %s119_s18 }
   0x9   :  { %p144_p2 = scmp.lt.s32.totalorder %s142_s19, %s138_s0 }
   0xb   :  { %v22_v4 = vld [vmem:[#allocation2] sm:$0x1]  ;;  %p145_p3 = por %p144_p2, %p143_p1 }
   0xd   :  { %p146_p4 = pnand %p145_p3, %p139_p0 }
  0xc5   :  { %v99_v5 = vpop.f32.mrf.mxu0 }
  0xc6   :  { %v103_v6 = vadd.f32 %v99_v5, %v22_v4 }
  0xc7   :  { %v134_v7 = vpop.f32.mrf.mxu0 }
  0xc8   :  { %105 = vst.msk [vmem:[#allocation2] sm:$0x1] %vm20_vm3, %v103_v6 }
  0xcf   :  { %v109_v8 = vld [vmem:[#allocation2] sm:$0x1] }
  0xd0   :  { %v110_v9 = vmax.f32 %v109_v8, 0.0 }
  0xd2   :  { %111 = vst.msk [vmem:[#allocation3] sm:$0x1] %vm20_vm3, %v110_v9 }
  0xd3   :  { %149 = shalt.err (!%p146_p4)
}
  0xd4   :  { %121 = dma.vmem_to_hbm [thread:$0]  %s119_s18, 16, %s198_s3, [#allocation4]  }
  0xd5   :  { %158 = dma.done.wait [#allocation4], 16  }
  0xd6   :  { %159 = vsyncadd [#allocation4], 4294967280 }
  0xd7   :  { %125 = vsyncpa [#allocation4], 1 }

</bundles_post_ra>
